<compile_context>
chip_gen: v6e
topology: v6e:2x2x1
jax: 0.10.0
libtpu: 0.0.40
codegen_flags: <defaults>
</compile_context>

<pallas_src>
import functools
import math

import jax
import jax.numpy as jnp
from jax.experimental import pallas as pl
from jax.experimental.pallas import tpu as pltpu


def _round_up(x, m):
    return ((x + m - 1) // m) * m


def _vmem_capacity_bytes():
    try:
        return int(pltpu.get_tpu_info().vmem_capacity_bytes)
    except Exception:
        return 64 << 20  # conservative (v7x-sized) fallback


def _block_spec(shape, index_map, buffer_count=None):
    """BlockSpec with optional pipeline depth; silently falls back if the
    installed jax does not support pipeline_mode / pl.Buffered."""
    if buffer_count is not None and hasattr(pl, "Buffered"):
        try:
            return pl.BlockSpec(shape, index_map,
                                pipeline_mode=pl.Buffered(buffer_count))
        except Exception:
            pass
    return pl.BlockSpec(shape, index_map)


def _gated_mlp_kernel(x_ref, w01_ref, wp_ref, o_ref, acc_ref, *, tf, red_axis):
    j = pl.program_id(red_axis)

    @pl.when(j == 0)
    def _():
        acc_ref[...] = jnp.zeros_like(acc_ref)

    x = x_ref[...]                                                     # (tm, H) bf16
    # Fused up + gate projection: one MXU launch per F tile, f32 result.
    h01 = jnp.dot(x, w01_ref[...], preferred_element_type=jnp.float32)  # (tm, 2*tf)
    h0 = h01[:, :tf]
    h1 = h01[:, tf:]
    g = (h0 * jax.nn.sigmoid(h0)) * h1                                  # SiLU(h0) * h1
    # Down projection, accumulated over F tiles in f32.
    acc_ref[...] += jnp.dot(g.astype(wp_ref.dtype), wp_ref[...],
                            preferred_element_type=jnp.float32)

    @pl.when(j == pl.num_programs(red_axis) - 1)
    def _():
        o_ref[...] = acc_ref[...].astype(o_ref.dtype)


def prepare_exaone_mlp_weights(w_fc0, w_fc1, w_proj, *, tf=256,
                               compute_dtype=jnp.bfloat16):
    """One-time (model init) weight prep.  PyTorch nn.Linear layouts:
         w_fc0, w_fc1 : [F, H]  (out_features, in_features)
         w_proj       : [H, F]
       Returns:
         w01 : [nt, H, 2*tf]  -- tile j is the fully HBM-contiguous block
                                 [W0_j | W1_j]  (one sequential DMA per step)
         wp  : [F_pad, H]     -- c_proj pre-transposed to [in, out]
       F is zero-padded up to a multiple of 2*tf so the reduction axis can be
       split in two halves across TensorCores; padding contributes exactly 0."""
    F, H = w_fc0.shape
    assert w_fc1.shape == (F, H) and w_proj.shape == (H, F)
    assert tf % 128 == 0, "tf must be a multiple of 128 (lane width)"
    f_pad = _round_up(F, 2 * tf)
    nt = f_pad // tf

    w0t = jnp.zeros((H, f_pad), w_fc0.dtype).at[:, :F].set(w_fc0.T)
    w1t = jnp.zeros((H, f_pad), w_fc1.dtype).at[:, :F].set(w_fc1.T)
    w0t = w0t.reshape(H, nt, tf).transpose(1, 0, 2)        # (nt, H, tf)
    w1t = w1t.reshape(H, nt, tf).transpose(1, 0, 2)
    w01 = jnp.concatenate([w0t, w1t], axis=2)              # (nt, H, 2*tf)

    wp = jnp.zeros((f_pad, H), w_proj.dtype).at[:F, :].set(w_proj.T)
    return w01.astype(compute_dtype), wp.astype(compute_dtype)


def exaone_gated_mlp(hidden_states, w01, wp, *, tm=None, split_reduction=None,
                     compute_dtype=jnp.bfloat16):
    """hidden_states: [..., H]; w01/wp from prepare_exaone_mlp_weights."""
    orig_shape = hidden_states.shape
    H = orig_shape[-1]
    nt, h_w, two_tf = w01.shape
    tf = two_tf // 2
    f_pad = wp.shape[0]
    assert h_w == H and wp.shape[1] == H and f_pad == nt * tf

    out_dtype = hidden_states.dtype
    M = math.prod(orig_shape[:-1])
    x = hidden_states.reshape(M, H).astype(compute_dtype)

    # ---- generation-aware tile sizing --------------------------------------
    vmem_cap = _vmem_capacity_bytes()
    # 128 MiB parts (v5e/v6e): tm up to 1024 keeps prefill MXU-bound.
    # ~64 MiB parts (v7x): cap tm at 512 so tiles + f32 temporaries fit.
    tm_cap = 1024 if vmem_cap >= (96 << 20) else 512
    m8 = _round_up(max(M, 1), 8)            # >= 8 sublanes, keeps vreg layout clean
    if tm is None:
        if m8 <= tm_cap:
            tm = m8
        else:
            tm = tm_cap
            # avoid >50% padding waste on ragged prefill token counts
            while tm > 256 and 2 * (_round_up(M, tm) - M) > tm:
                tm //= 2
    assert tm % 8 == 0
    m_pad = _round_up(M, tm)
    if m_pad != M:
        x = jnp.pad(x, ((0, m_pad - M), (0, 0)))   # zero rows -> zero outputs

    n_tok = m_pad // tm
    # Decode / small batch: a single token tile would leave a second v7x TC
    # idle, so split the (weight-bandwidth-bound) F reduction in two halves
    # over a leading "parallel" grid axis.  Harmless on 1-TC chips.
    if split_reduction is None:
        split_reduction = (n_tok == 1) and (nt % 2 == 0) and (nt >= 2)

    cb = jnp.dtype(compute_dtype).itemsize
    ob = jnp.dtype(out_dtype).itemsize

    if split_reduction:
        n_half = nt // 2
        grid = (2, n_tok, n_half)
        in_specs = [
            _block_spec((tm, H), lambda c, i, j: (i, 0),
                        buffer_count=1 if n_half >= 4 else None),
            pl.BlockSpec((None, H, 2 * tf), lambda c, i, j: (c * n_half + j, 0, 0)),
            pl.BlockSpec((tf, H), lambda c, i, j: (c * n_half + j, 0)),
        ]
        out_shape = jax.ShapeDtypeStruct((2, m_pad, H), jnp.float32)
        out_specs = pl.BlockSpec((None, tm, H), lambda c, i, j: (c, i, 0))
        dim_sem = ("parallel", "parallel", "arbitrary")
        out_tile_bytes = tm * H * 4
    else:
        grid = (n_tok, nt)
        in_specs = [
            _block_spec((tm, H), lambda i, j: (i, 0),
                        buffer_count=1 if nt >= 4 else None),
            pl.BlockSpec((None, H, 2 * tf), lambda i, j: (j, 0, 0)),
            pl.BlockSpec((tf, H), lambda i, j: (j, 0)),
        ]
        out_shape = jax.ShapeDtypeStruct((m_pad, H), out_dtype)
        out_specs = pl.BlockSpec((tm, H), lambda i, j: (i, 0))
        dim_sem = ("parallel", "arbitrary")
        out_tile_bytes = tm * H * ob

    # ---- VMEM budget: double-buffered tiles + f32 acc + f32 temporaries ----
    vmem_bytes = (2 * tm * H * cb               # x tile (double-buffer worst case)
                  + 2 * H * (2 * tf) * cb       # fused [W0_j|W1_j] tile
                  + 2 * tf * H * cb             # Wp tile
                  + 2 * out_tile_bytes          # output tile
                  + tm * H * 4                  # f32 accumulator scratch
                  + 2 * tm * (2 * tf) * 4       # h01 / gate f32 temporaries
                  + (4 << 20))                  # Mosaic internal scratch headroom
    vmem_limit = max(min(int(vmem_bytes * 1.15), int(0.85 * vmem_cap)), 16 << 20)

    cost = pl.CostEstimate(
        flops=6 * m_pad * H * f_pad,
        transcendentals=m_pad * f_pad,
        bytes_accessed=(m_pad * H * cb                    # x
                        + n_tok * 3 * H * f_pad * cb      # weights per token tile
                        + m_pad * H * ob))                # output

    kernel = functools.partial(_gated_mlp_kernel, tf=tf, red_axis=len(grid) - 1)

    out = pl.pallas_call(
        kernel,
        out_shape=out_shape,
        grid_spec=pltpu.PrefetchScalarGridSpec(
            num_scalar_prefetch=0,
            grid=grid,
            in_specs=in_specs,
            out_specs=out_specs,
            scratch_shapes=[pltpu.VMEM((tm, H), jnp.float32)],
        ),
        compiler_params=pltpu.CompilerParams(
            dimension_semantics=dim_sem,
            vmem_limit_bytes=vmem_limit),
        cost_estimate=cost,
    )(x, w01, wp)

    if split_reduction:
        out = out.sum(axis=0).astype(out_dtype)   # combine per-core partials
    if m_pad != M:
        out = out[:M]
    return out.reshape(orig_shape)


def _reference(hidden_states, w_fc0, w_fc1, w_proj):
    x = hidden_states.astype(jnp.float32)
    h0 = x @ w_fc0.astype(jnp.float32).T
    h1 = x @ w_fc1.astype(jnp.float32).T
    g = jax.nn.silu(h0) * h1
    return (g @ w_proj.astype(jnp.float32).T).astype(hidden_states.dtype)


if __name__ == "__main__":
    # Small, tile-friendly shapes implied by the module:
    #   hidden_size = 128, intermediate_size = 256, batch = 2, seq = 8
    B, S, H, F = 2, 8, 128, 256

    key = jax.random.PRNGKey(0)
    kx, k0, k1, kp = jax.random.split(key, 4)
    x = jax.random.normal(kx, (B, S, H), dtype=jnp.float32)
    # nn.Linear weight layouts: [out_features, in_features]
    w_fc0 = jax.random.normal(k0, (F, H), dtype=jnp.float32) * 0.05
    w_fc1 = jax.random.normal(k1, (F, H), dtype=jnp.float32) * 0.05
    w_proj = jax.random.normal(kp, (H, F), dtype=jnp.float32) * 0.05

    # One-time weight prep (model init); the per-call kernel does no transposes.
    w01, wp = prepare_exaone_mlp_weights(w_fc0, w_fc1, w_proj, tf=256)

    ref = _reference(x, w_fc0, w_fc1, w_proj)

    def rel_err(a, b):
        a = a.astype(jnp.float32)
        b = b.astype(jnp.float32)
        return float(jnp.linalg.norm(a - b) / (jnp.linalg.norm(b) + 1e-12))

    # 1) decode-style path: single token tile -> F reduction split across TCs.
    out_split = jax.block_until_ready(exaone_gated_mlp(x, w01, wp))
    assert out_split.shape == x.shape
    assert rel_err(out_split, ref) < 2e-2, f"split-path mismatch: {rel_err(out_split, ref)}"

    # 2) plain reduction path (what multi-tile prefill uses).
    out_plain = jax.block_until_ready(
        exaone_gated_mlp(x, w01, wp, split_reduction=False))
    assert rel_err(out_plain, ref) < 2e-2, f"plain-path mismatch: {rel_err(out_plain, ref)}"

    # 3) ragged token count -> exercises zero-padding of M.
    x_rag = x.reshape(B * S, H)[:11].reshape(1, 11, H)
    ref_rag = _reference(x_rag, w_fc0, w_fc1, w_proj)
    out_rag = jax.block_until_ready(exaone_gated_mlp(x_rag, w01, wp))
    assert out_rag.shape == x_rag.shape
    assert rel_err(out_rag, ref_rag) < 2e-2, f"ragged-path mismatch: {rel_err(out_rag, ref_rag)}"

    print("KERNEL_OK")
</pallas_src>

<mosaic_0001>
module attributes {stable_mosaic.version = 11 : i64} {
  func.func @_gated_mlp_kernel(%arg0: i32, %arg1: i32, %arg2: i32, %arg3: memref<16x128xbf16, #tpu.memory_space<vmem>>, %arg4: memref<1x128x512xbf16, #tpu.memory_space<vmem>>, %arg5: memref<256x128xbf16, #tpu.memory_space<vmem>>, %arg6: memref<1x16x128xf32, #tpu.memory_space<vmem>>, %arg7: memref<16x128xf32, #tpu.memory_space<vmem>>) attributes {dimension_semantics = [#tpu.dimension_semantics<parallel>, #tpu.dimension_semantics<parallel>, #tpu.dimension_semantics<arbitrary>], iteration_bounds = array<i64: 2, 1, 1>, scalar_prefetch = 0 : i64, scratch_operands = 1 : i64, tpu.core_type = #tpu.core_type<tc>, window_params = [{transform_indices = @transform_0, window_bounds = array<i64: 16, 128>}, {transform_indices = @transform_1, window_bounds = array<i64: 1, 128, 512>}, {transform_indices = @transform_2, window_bounds = array<i64: 256, 128>}, {transform_indices = @transform_3, window_bounds = array<i64: 1, 16, 128>}]} {
    %c0_i32 = arith.constant 0 : i32
    %0 = arith.cmpi eq, %arg2, %c0_i32 : i32
    %1 = arith.extui %0 : i1 to i32
    %c0_i32_0 = arith.constant 0 : i32
    %2 = arith.cmpi ne, %1, %c0_i32_0 : i32
    scf.if %2 {
      %cst_15 = arith.constant 0.000000e+00 : f32
      %25 = vector.broadcast %cst_15 : f32 to vector<16x128xf32>
      %c0_16 = arith.constant 0 : index
      %c0_17 = arith.constant 0 : index
      %26 = vector.load %arg7[%c0_16, %c0_17] : memref<16x128xf32, #tpu.memory_space<vmem>>, vector<16x128xf32>
      tpu.vector_store %arg7[%c0_16, %c0_17], %25 {strides = array<i32>} : memref<16x128xf32, #tpu.memory_space<vmem>>, vector<16x128xf32>,
    } else {
    }
    %c0 = arith.constant 0 : index
    %c0_1 = arith.constant 0 : index
    %3 = vector.load %arg3[%c0, %c0_1] : memref<16x128xbf16, #tpu.memory_space<vmem>>, vector<16x128xbf16>
    %c0_2 = arith.constant 0 : index
    %c0_3 = arith.constant 0 : index
    %c0_4 = arith.constant 0 : index
    %4 = vector.load %arg4[%c0_2, %c0_3, %c0_4] : memref<1x128x512xbf16, #tpu.memory_space<vmem>>, vector<1x128x512xbf16>
    %5 = vector.shape_cast %4 : vector<1x128x512xbf16> to vector<128x512xbf16>
    %cst = arith.constant dense<0.000000e+00> : vector<16x512xf32>
    %6 = tpu.matmul %3, %5, %cst {dimension_numbers = #tpu.dot_dimension_numbers<[1], [0], [0], [1], [0, 0, 1, 1], [], []>} : vector<16x128xbf16>, vector<128x512xbf16>, vector<16x512xf32> -> vector<16x512xf32>
    %7 = vector.extract_strided_slice %6 {offsets = [0, 0], sizes = [16, 256], strides = [1, 1]} : vector<16x512xf32> to vector<16x256xf32>
    %8 = vector.extract_strided_slice %6 {offsets = [0, 256], sizes = [16, 256], strides = [1, 1]} : vector<16x512xf32> to vector<16x256xf32>
    %9 = arith.negf %7 : vector<16x256xf32>
    %10 = math.exp %9 : vector<16x256xf32>
    %cst_5 = arith.constant 1.000000e+00 : f32
    %11 = vector.broadcast %cst_5 : f32 to vector<16x256xf32>
    %12 = arith.addf %11, %10 : vector<16x256xf32>
    %13 = arith.divf %11, %12 : vector<16x256xf32>
    %14 = arith.mulf %7, %13 : vector<16x256xf32>
    %15 = arith.mulf %14, %8 : vector<16x256xf32>
    %c0_6 = arith.constant 0 : index
    %c0_7 = arith.constant 0 : index
    %16 = vector.load %arg7[%c0_6, %c0_7] : memref<16x128xf32, #tpu.memory_space<vmem>>, vector<16x128xf32>
    %17 = arith.truncf %15 : vector<16x256xf32> to vector<16x256xbf16>
    %c0_8 = arith.constant 0 : index
    %c0_9 = arith.constant 0 : index
    %18 = vector.load %arg5[%c0_8, %c0_9] : memref<256x128xbf16, #tpu.memory_space<vmem>>, vector<256x128xbf16>
    %cst_10 = arith.constant dense<0.000000e+00> : vector<16x128xf32>
    %19 = tpu.matmul %17, %18, %cst_10 {dimension_numbers = #tpu.dot_dimension_numbers<[1], [0], [0], [1], [0, 0, 1, 1], [], []>} : vector<16x256xbf16>, vector<256x128xbf16>, vector<16x128xf32> -> vector<16x128xf32>
    %20 = arith.addf %16, %19 : vector<16x128xf32>
    %c0_11 = arith.constant 0 : index
    %c0_12 = arith.constant 0 : index
    %21 = vector.load %arg7[%c0_11, %c0_12] : memref<16x128xf32, #tpu.memory_space<vmem>>, vector<16x128xf32>
    tpu.vector_store %arg7[%c0_11, %c0_12], %20 {strides = array<i32>} : memref<16x128xf32, #tpu.memory_space<vmem>>, vector<16x128xf32>,
    %c0_i32_13 = arith.constant 0 : i32
    %22 = arith.cmpi eq, %arg2, %c0_i32_13 : i32
    %23 = arith.extui %22 : i1 to i32
    %c0_i32_14 = arith.constant 0 : i32
    %24 = arith.cmpi ne, %23, %c0_i32_14 : i32
    scf.if %24 {
      %c0_15 = arith.constant 0 : index
      %c0_16 = arith.constant 0 : index
      %25 = vector.load %arg7[%c0_15, %c0_16] : memref<16x128xf32, #tpu.memory_space<vmem>>, vector<16x128xf32>
      %c0_17 = arith.constant 0 : index
      %c0_18 = arith.constant 0 : index
      %c0_19 = arith.constant 0 : index
      %26 = vector.load %arg6[%c0_17, %c0_18, %c0_19] : memref<1x16x128xf32, #tpu.memory_space<vmem>>, vector<1x16x128xf32>
      %27 = vector.shape_cast %26 : vector<1x16x128xf32> to vector<16x128xf32>
      %28 = vector.shape_cast %25 : vector<16x128xf32> to vector<1x16x128xf32>
      tpu.vector_store %arg6[%c0_17, %c0_18, %c0_19], %28 {strides = array<i32>} : memref<1x16x128xf32, #tpu.memory_space<vmem>>, vector<1x16x128xf32>,
    } else {
    }
    return
  }
  func.func @transform_0(%arg0: i32, %arg1: i32, %arg2: i32) -> (i32, i32) {
    %c0_i32 = arith.constant 0 : i32
    %c0_i32_0 = arith.constant 0 : i32
    return %arg1, %c0_i32 : i32, i32
  }
  func.func @transform_1(%arg0: i32, %arg1: i32, %arg2: i32) -> (i32, i32, i32) {
    %c1_i32 = arith.constant 1 : i32
    %0 = arith.muli %arg0, %c1_i32 : i32
    %1 = arith.addi %0, %arg2 : i32
    %c0_i32 = arith.constant 0 : i32
    %c0_i32_0 = arith.constant 0 : i32
    %c0_i32_1 = arith.constant 0 : i32
    return %1, %c0_i32, %c0_i32_0 : i32, i32, i32
  }
  func.func @transform_2(%arg0: i32, %arg1: i32, %arg2: i32) -> (i32, i32) {
    %c1_i32 = arith.constant 1 : i32
    %0 = arith.muli %arg0, %c1_i32 : i32
    %1 = arith.addi %0, %arg2 : i32
    %c0_i32 = arith.constant 0 : i32
    %c0_i32_0 = arith.constant 0 : i32
    return %1, %c0_i32 : i32, i32
  }
  func.func @transform_3(%arg0: i32, %arg1: i32, %arg2: i32) -> (i32, i32, i32) {
    %c0_i32 = arith.constant 0 : i32
    %c0_i32_0 = arith.constant 0 : i32
    return %arg0, %arg1, %c0_i32 : i32, i32, i32
  }
}

</mosaic_0001>

<bundles_post_ra>
// kernel: tpu_custom_call.1
= control target key start
LH: loop header
LB: loop body
LE: loop exit
PB: predicated region body
PF: predicated region fallthrough
CT: control target
= control target key end

     0   :  { %8 = vsyncpa [#allocation4], 0  ;;  %s1631_s0 = inlined_call_operand.hbm [shape: bf16[16,128], index: 0, kind: input, shape index: {}]   ;;  %s1632_s1 = inlined_call_operand.hbm [shape: bf16[2,128,512], index: 1, kind: input, shape index: {}]   ;;  %s1633_s2 = inlined_call_operand.hbm [shape: bf16[512,128], index: 2, kind: input, shape index: {}]   ;;  %s1634_s3 = inlined_call_operand.hbm [shape: f32[2,16,128], index: 3, kind: output, shape index: {}]  }
   0x1   :  { %9 = vsyncpa [#allocation7], 0 }
   0x2   :  { %11 = vsyncpa [#allocation7 + $0x1], 0 }
   0x3   :  { %12 = vsyncpa [#allocation5], 0 }
   0x4   :  { %14 = vsyncpa [#allocation5 + $0x1], 0  ;;  %s1393_s12 = smov 0   ;;  %s1395_s13 = smov 0  }
   0x5   :  { %s1397_s14 = smov 0   ;;  %s1399_s15 = smov 0  }
   0x6   :  { %s1401_s16 = smov 0   ;;  %s1403_s17 = smov 0  }
   0x7 LB: > { %s39_s18 = sadd.s32 1, %s1356_s16  ;;  %s74_s19 = sadd.s32 1, %s1348_s14  ;;  %s1360_s17 = sphi %s1403_s17, %s20_s17   ;;  %s1356_s16 = sphi %s1401_s16, %s1649_s16   ;;  %s1352_s15 = sphi %s1399_s15, %s1648_s15   ;;  %s1348_s14 = sphi %s1397_s14, %s1647_s14   ;;  %s1344_s13 = sphi %s1395_s13, %s1646_s13   ;;  %s1340_s12 = sphi %s1393_s12, %s1645_s12  }
   0x8   : > { %p41_p0 = scmp.ge.s32.totalorder %s39_s18, 2  ;;  %p81_p1 = scmp.ne.s32.totalorder %s1348_s14, %s1344_s13 }
   0x9   : > { %p82_p2 = scmp.eq.s32.totalorder %s1360_s17, 0  ;;  %p1054_p5 = scmp.lt.s32.totalorder %s1360_s17, 2 }
   0xa   : > { %s1651_s18 = smov (%p41_p0, %s39_s18), 0  ;;  %s183_s21 = sand.u32 1, %s1360_s17  }
   0xb   : > { %p83_p4 = por %p82_p2, %p81_p1  ;;  %s71_s20 = ssub.s32 %s1356_s16, %s1651_s18 }
   0xc   : > { %p72_p6 = scmp.eq.s32.totalorder %s71_s20, 0  ;;  %s185_s22 = sand.u32 1, %s1348_s14  }
   0xd   : > { %s1003_s23 = sshll.u32 %s1356_s16, 12  ;;  %s934_s25 = sshll.u32 %s185_s22, 8 }
   0xe   : > { %s1441_s24 = scalar_select %p72_p6, %s1348_s14, %s74_s19  }
   0xf   : > { %s194_s28 = scalar_lea.hbm %s1632_s1, %s1003_s23  ;;  %p1446_p7 = pnand %p1054_p5, %p83_p4 }
  0x10   : > { %s187_s30 = scalar_lea.vmem [#allocation6], %s934_s25  ;;  %s1450_s5 = sshll.u32 %s185_s22, 7 }
  0x11   : > { %s195_s4 = sshll.u32 %s187_s30, 4  ;;  %s1452_s6 = scalar_lea.sflag [#allocation7], %s183_s21  ;;  %s196_s4 = int_to_ptr.vmem [resolvable:$true] %s195_s4 }
  0x12   : > { %p1196_p8 = pneg %p1446_p7  ;;  %s1207_s7 = scalar_lea.vmem %s196_s4, 4096 }
  0x13   : > { %p1208_p9 = scmp.ne.s32.totalorder %s196_s4, %s1207_s7  ;;  %s1362_s8 = smov [#allocation6]  }
  0x14   : > { %s1212_s9 = sshll.u32 %s1362_s8, 4  ;;  %s1213_s9 = int_to_ptr.vmem [resolvable:$false] %s1212_s9 }
  0x15   : > { %p1210_p10 = pnand %p1208_p9, %p1196_p8  ;;  %s1214_s10 = scalar_lea.vmem %s1213_s9, 8192 }
  0x16   : > { %p1215_p12 = scmp.lt.s32.totalorder %s196_s4, %s1213_s9  ;;  %p1216_p13 = scmp.lt.s32.totalorder %s1214_s10, %s1207_s7 }
  0x17   : > { %p1211_p11 = pneg %p1210_p10 }
  0x18   : > { %p1217_p0 = por %p1216_p13, %p1215_p12 }
  0x1a   : > { %p1218_p2 = pnand %p1217_p0, %p1211_p11 }
  0x1c   : > { %1221 = shalt.err (!%p1218_p2)
}
  0x1d   : > { %s1363_s11 = smov 256   ;;  %s1364_s19 = smov 16  }
  0x1e   : > { %1045 = dma.hbm_to_vmem [thread:$0]  (!%p1446_p7), %s194_s28, 4096, %s196_s4, %s1452_s6, %s1363_s11, %s1363_s11, %s1364_s19  }
  0x1f   : > { %s1463_s20 = sadd.s32 4294967295, %s1360_s17   ;;  %s930_s21 = sadd.s32 4294967294, %s1360_s17  }
  0x20   : > { %p87_p4 = scmp.ne.s32.totalorder %s1344_s13, %s1340_s12  ;;  %p88_p5 = scmp.eq.s32.totalorder %s1463_s20, 0 }
  0x21   : > { %p141_p6 = scmp.eq.s32.totalorder %s1463_s20, 1  ;;  %p147_p9 = scmp.eq.s32.totalorder %s930_s21, 1 }
  0x22   : > { %p1472_p10 = por %p88_p5, %p87_p4  ;;  %p931_p11 = scmp.ge.s32.totalorder %s1360_s17, 1 }
  0x23   : > { %p1480_p12 = por %p141_p6, %p81_p1  ;;  %p1484_p13 = por %p147_p9, %p87_p4 }
  0x24   : > { %p154_p0 = scmp.lt.s32.totalorder %s1360_s17, 3  ;;  %s209_s26 = scalar_lea.vmem [#allocation8], %s1450_s5 }
  0x25   : > { %s1638_s23 = scalar_select %p1480_p12, 1, 0 }
  0x26   : > { %s1639_s25 = scalar_select %p1484_p13, 1, 0 }
  0x27   : > { %s217_s27 = sshll.u32 %s209_s26, 4  ;;  %p1490_p2 = pnand %p931_p11, %p154_p0  ;;  %s218_s27 = int_to_ptr.vmem [resolvable:$true] %s217_s27 }
  0x28   : > { %s1365_s30 = smov [#allocation3]   ;;  %s1004_s7 = sshll.u32 %s1356_s16, 11 }
  0x29   : > { %s169_s4 = sshll.u32 %s1365_s30, 4  ;;  %p1038_p1 = pneg %p1490_p2  ;;  %s1500_s4 = int_to_ptr.vmem [resolvable:$true] %s169_s4 }
  0x2a   : > { %s216_s10 = scalar_lea.hbm %s1633_s2, %s1004_s7  ;;  %s1235_s11 = scalar_lea.vmem %s218_s27, 2048 }
  0x2b   : > { %p1504_p4 = pnand %p1038_p1, %p88_p5  ;;  %p1236_p6 = scmp.ne.s32.totalorder %s218_s27, %s1235_s11 }
  0x2c   : > { %s1366_s19 = smov [#allocation8]  }
  0x2d   : > { %p1238_p9 = pnand %p1236_p6, %p1196_p8  ;;  %s1240_s21 = sshll.u32 %s1366_s19, 4  ;;  %s1241_s21 = int_to_ptr.vmem [resolvable:$false] %s1240_s21 }
  0x2e   : > { %s1242_s26 = scalar_lea.vmem %s1241_s21, 4096  ;;  %p1243_p0 = scmp.lt.s32.totalorder %s218_s27, %s1241_s21 }
  0x2f   : > { %p1239_p11 = pneg %p1238_p9  ;;  %p1244_p3 = scmp.lt.s32.totalorder %s1242_s26, %s1235_s11 }
  0x31   : > { %p1245_p13 = por %p1244_p3, %p1243_p0 }
  0x33   : > { %p1246_p12 = pnand %p1245_p13, %p1239_p11 }
  0x35   : > { %1249 = shalt.err (!%p1246_p12)
}
  0x36   : > { %s1367_s30 = smov 64   ;;  %s1368_s7 = smov 4  }
  0x37   : > { %1048 = dma.hbm_to_vmem [thread:$0]  (!%p1446_p7), %s216_s10, 2048, %s218_s27, %s1452_s6, %s1367_s30, %s1367_s30, %s1368_s7  }
  0x38   : > { %p1252_p8 = pneg %p1504_p4  ;;  %s1261_s8 = scalar_lea.vmem %s1500_s4, 128 }
  0x39   : > { %p1262_p1 = scmp.ne.s32.totalorder %s1500_s4, %s1261_s8  ;;  %p1269_p3 = scmp.lt.s32.totalorder %s1500_s4, %s1500_s4 }
  0x3a   : > { %p1270_p13 = scmp.lt.s32.totalorder %s1261_s8, %s1261_s8 }
  0x3b   : > { %p1264_p6 = pnand %p1262_p1, %p1252_p8 }
  0x3c   : > { %p1271_p12 = por %p1270_p13, %p1269_p3 }
  0x3d   : > { %p1265_p9 = pneg %p1264_p6 }
  0x3f   : > { %p1272_p11 = pnand %p1271_p12, %p1265_p9 }
  0x41   : > { %1275 = shalt.err (!%p1272_p11)
}
  0x42   : > { %1041 = dma.hbm_to_vmem [thread:$0]  (!%p1504_p4), %s1631_s0, 128, %s1500_s4, [#allocation4], %s1367_s30, %s1367_s30, %s1368_s7  }
  0x43   : > { %229 = sbr.rel (%p1490_p2) target bundleno = 564 (0x234), region = 32 }
  0x48   : > { %1327 = dma.done.wait (%p88_p5), [#allocation4], 128  }
  0x49   : > { %1329 = vsyncadd (%p88_p5), [#allocation4], 4294967168  ;;  %s235_s29 = sand.u32 1, %s1463_s20   ;;  %s1534_s6 = sand.u32 1, %s1344_s13  }
  0x4a   : > { %s942_s27 = sshll.u32 %s1534_s6, 8  ;;  %s236_s10 = scalar_lea.sflag [#allocation7], %s235_s29 }
  0x4b   : > { %s1537_s5 = scalar_lea.vmem [#allocation6], %s942_s27 }
  0x4c   : > { %1331 = dma.done.wait (%p1472_p10), %s236_s10, 6144  }
  0x4d   : > { %1333 = vsyncadd (%p1472_p10), %s236_s10, 4294961152  ;;  %v1369_v0 = vmov 0   ;;  %v1113_v1 = vld [vmem:[%s1537_s5 + $0xe4] ss:$16 sps:$4 sm:$0xff]   ;;  %v1115_v2 = vld [vmem:[%s1537_s5 + $0xe0] ss:$16 sps:$4 sm:$0xff]  }
  0x4e   : > { %520 = vmatprep.mubr.bf16.mxu0 %v1369_v0  ;;  %563 = vmatprep.mubr.bf16.mxu1 %v1369_v0  ;;  %v1116_v3 = vld [vmem:[%s1537_s5 + $0xc4] ss:$16 sps:$4 sm:$0xff]   ;;  %v1118_v4 = vld [vmem:[%s1537_s5 + $0xc0] ss:$16 sps:$4 sm:$0xff]   ;;  %v1136_v9 = vld [vmem:[%s1537_s5 + $0xec] ss:$16 sps:$4 sm:$0xff]  }
  0x4f   : > { %488 = vmatprep.subr.bf16.mxu0 %v1113_v1  ;;  %v1119_v5 = vld [vmem:[%s1537_s5 + $0xa4] ss:$16 sps:$4 sm:$0xff]   ;;  %v1121_v6 = vld [vmem:[%s1537_s5 + $0xa0] ss:$16 sps:$4 sm:$0xff]   ;;  %v1139_v10 = vld [vmem:[%s1537_s5 + $0xe8] ss:$16 sps:$4 sm:$0xff]   ;;  %531 = vmatprep.subr.bf16.mxu1 %v1136_v9 }
  0x50   : > { %489 = vmatpush1.bf16.msra.mxu0 %v1115_v2  ;;  %v1122_v7 = vld [vmem:[%s1537_s5 + $0x84] ss:$16 sps:$4 sm:$0xff]   ;;  %v1124_v8 = vld [vmem:[%s1537_s5 + $0x80] ss:$16 sps:$4 sm:$0xff]   ;;  %v1141_v12 = vld [vmem:[%s1537_s5 + $0xcc] ss:$16 sps:$4 sm:$0xff]   ;;  %532 = vmatpush1.bf16.msra.mxu1 %v1139_v10 }
  0x51   : > { %490 = vmatprep.subr.bf16.mxu0 %v1116_v3  ;;  %v1125_v11 = vld [vmem:[%s1537_s5 + $0x64] ss:$16 sps:$4 sm:$0xff]   ;;  %v1143_v13 = vld [vmem:[%s1537_s5 + $0xc8] ss:$16 sps:$4 sm:$0xff]   ;;  %v1127_v14 = vld [vmem:[%s1537_s5 + $0x60] ss:$16 sps:$4 sm:$0xff]   ;;  %533 = vmatprep.subr.bf16.mxu1 %v1141_v12 }
  0x52   : > { %v1144_v15 = vld [vmem:[%s1537_s5 + $0xac] ss:$16 sps:$4 sm:$0xff]   ;;  %v1128_v16 = vld [vmem:[%s1537_s5 + $0x44] ss:$16 sps:$4 sm:$0xff]   ;;  %v1146_v17 = vld [vmem:[%s1537_s5 + $0xa8] ss:$16 sps:$4 sm:$0xff]  }
  0x53   : > { %v1130_v18 = vld [vmem:[%s1537_s5 + $0x40] ss:$16 sps:$4 sm:$0xff]   ;;  %v1147_v19 = vld [vmem:[%s1537_s5 + $0x8c] ss:$16 sps:$4 sm:$0xff]   ;;  %v1131_v20 = vld [vmem:[%s1537_s5 + $0x24] ss:$16 sps:$4 sm:$0xff]  }
  0x54   : > { %491 = vmatpush1.bf16.msra.mxu0 %v1118_v4  ;;  %534 = vmatpush1.bf16.msra.mxu1 %v1143_v13  ;;  %v1149_v21 = vld [vmem:[%s1537_s5 + $0x88] ss:$16 sps:$4 sm:$0xff]   ;;  %v1133_v22 = vld [vmem:[%s1537_s5 + $0x20] ss:$16 sps:$4 sm:$0xff]   ;;  %v1150_v23 = vld [vmem:[%s1537_s5 + $0x6c] ss:$16 sps:$4 sm:$0xff]  }
  0x55   : > { %492 = vmatprep.subr.bf16.mxu0 %v1119_v5  ;;  %535 = vmatprep.subr.bf16.mxu1 %v1144_v15  ;;  %v1134_v24 = vld [vmem:[%s1537_s5 + $0x4] ss:$16 sps:$4 sm:$0xff]   ;;  %v1152_v25 = vld [vmem:[%s1537_s5 + $0x68] ss:$16 sps:$4 sm:$0xff]   ;;  %v1138_v26 = vld [vmem:[%s1537_s5] ss:$16 sps:$4 sm:$0xff]  }
  0x56   : > { %v1153_v27 = vld [vmem:[%s1537_s5 + $0x4c] ss:$16 sps:$4 sm:$0xff]   ;;  %v1155_v29 = vld [vmem:[%s1537_s5 + $0x48] ss:$16 sps:$4 sm:$0xff]   ;;  %s943_s20 = sshll.u32 %s1534_s6, 7  ;;  %s944_s28 = sshll.u32 %s1534_s6, 4 }
  0x57   : > { %v1140_v28 = vld [vmem:[#allocation3] sm:$0xff]   ;;  %s248_s22 = scalar_lea.vmem [#allocation8], %s943_s20  ;;  %s275_s4 = scalar_lea.vmem [#allocation9], %s944_s28 }
  0x58   : > { %493 = vmatpush1.bf16.msra.mxu0 %v1121_v6  ;;  %536 = vmatpush1.bf16.msra.mxu1 %v1146_v17  ;;  %v1156_v30 = vld [vmem:[%s1537_s5 + $0x2c] ss:$16 sps:$4 sm:$0xff]   ;;  %v1158_v31 = vld [vmem:[%s1537_s5 + $0x28] ss:$16 sps:$4 sm:$0xff]   ;;  %v1164_v36 = vld [vmem:[%s248_s22 + $0x70] sm:$0xff]   ;;  %s806_s19 = sshll.u32 %s275_s4, 4  ;;  %s1578_s19 = int_to_ptr.vmem [resolvable:$true] %s806_s19 }
  0x59   : > { %494 = vmatprep.subr.bf16.mxu0 %v1122_v7  ;;  %537 = vmatprep.subr.bf16.mxu1 %v1147_v19  ;;  %v1159_v32 = vld [vmem:[%s1537_s5 + $0xc] ss:$16 sps:$4 sm:$0xff]   ;;  %v1161_v33 = vld [vmem:[%s1537_s5 + $0x8] ss:$16 sps:$4 sm:$0xff]   ;;  %v1165_v37 = vld [vmem:[%s248_s22 + $0x30] sm:$0xff]   ;;  %s1005_s21 = sshll.u32 %s1352_s15, 8 }
  0x5a   : > { %v1162_v34 = vld [vmem:[%s248_s22 + $0x78] sm:$0xff]   ;;  %v1166_v38 = vld [vmem:[%s248_s22 + $0x68] sm:$0xff]   ;;  %v1168_v40 = vld [vmem:[%s248_s22 + $0x60] sm:$0xff]   ;;  %s1583_s7 = scalar_lea.hbm %s1634_s3, %s1005_s21  ;;  %s791_s8 = scalar_lea.sflag [#allocation5], %s1534_s6 }
  0x5b   : > { %v1163_v35 = vld [vmem:[%s248_s22 + $0x38] sm:$0xff]   ;;  %v1167_v39 = vld [vmem:[%s248_s22 + $0x28] sm:$0xff]   ;;  %v1169_v41 = vld [vmem:[%s248_s22 + $0x20] sm:$0xff]   ;;  %s1276_s9 = scalar_lea.vmem %s1578_s19, 256  ;;  %p1642_p5 = scmp.ne.s32.totalorder %s1638_s23, 0 }
  0x5c   : > { %495 = vmatpush1.bf16.msra.mxu0 %v1124_v8  ;;  %538 = vmatpush1.bf16.msra.mxu1 %v1149_v21  ;;  %v1170_v42 = vld [vmem:[%s248_s22 + $0x58] sm:$0xff]   ;;  %v1172_v44 = vld [vmem:[%s248_s22 + $0x50] sm:$0xff]   ;;  %v1174_v46 = vld [vmem:[%s248_s22 + $0x48] sm:$0xff]   ;;  %p1277_p7 = scmp.ne.s32.totalorder %s1578_s19, %s1276_s9  ;;  %s1370_s15 = smov [#allocation9]  }
  0x5d   : > { %496 = vmatprep.subr.bf16.mxu0 %v1125_v11  ;;  %539 = vmatprep.subr.bf16.mxu1 %v1150_v23  ;;  %v1171_v43 = vld [vmem:[%s248_s22 + $0x18] sm:$0xff]   ;;  %v1173_v45 = vld [vmem:[%s248_s22 + $0x10] sm:$0xff]   ;;  %v1175_v47 = vld [vmem:[%s248_s22 + $0x8] sm:$0xff]   ;;  %s1280_s11 = sshll.u32 %s1370_s15, 4  ;;  %s1281_s11 = int_to_ptr.vmem [resolvable:$false] %s1280_s11 }
  0x5e   : > { %v1176_v48 = vld [vmem:[%s248_s22 + $0x40] sm:$0xff]   ;;  %p1278_p10 = pnand %p1277_p7, %p1642_p5  ;;  %s1282_s29 = scalar_lea.vmem %s1281_s11, 512 }
  0x5f   : > { %v1177_v49 = vld [vmem:[%s248_s22] sm:$0xff]   ;;  %p1283_p4 = scmp.lt.s32.totalorder %s1578_s19, %s1281_s11  ;;  %p1284_p0 = scmp.lt.s32.totalorder %s1282_s29, %s1276_s9 }
  0x60   : > { %497 = vmatpush1.bf16.msra.mxu0 %v1127_v14  ;;  %540 = vmatpush1.bf16.msra.mxu1 %v1152_v25  ;;  %p1279_p2 = pneg %p1278_p10 }
  0x61   : > { %498 = vmatprep.subr.bf16.mxu0 %v1128_v16  ;;  %541 = vmatprep.subr.bf16.mxu1 %v1153_v27  ;;  %p1285_p8 = por %p1284_p0, %p1283_p4 }
  0x63   : > { %p1286_p1 = pnand %p1285_p8, %p1279_p2 }
  0x64   : > { %499 = vmatpush1.bf16.msra.mxu0 %v1130_v18  ;;  %542 = vmatpush1.bf16.msra.mxu1 %v1155_v29 }
  0x65   : > { %500 = vmatprep.subr.bf16.mxu0 %v1131_v20  ;;  %543 = vmatprep.subr.bf16.mxu1 %v1156_v30 }
  0x68   : > { %501 = vmatpush1.bf16.msra.mxu0 %v1133_v22  ;;  %544 = vmatpush1.bf16.msra.mxu1 %v1158_v31 }
  0x69   : > { %502 = vmatprep.subr.bf16.mxu0 %v1134_v24  ;;  %545 = vmatprep.subr.bf16.mxu1 %v1159_v32 }
  0x6c   : > { %503 = vmatpush1.bf16.msra.mxu0 %v1138_v26  ;;  %546 = vmatpush1.bf16.msra.mxu1 %v1161_v33 }
  0x6d   : > { %1006 = vmatprep.subr.bf16.mxu0 %v1162_v34 }
  0x6f   : > { %521 = vmatmul.mubr.bf16.vlgmr.msra.gmra.mxu0 %v1140_v28  ;;  %564 = vmatmul.mubr.bf16.vlgmr.msra.gmra.mxu1 %v1140_v28 }
  0x70   : > { %1007 = vmatpush3.bf16.msra.mxu0 %v1163_v35 }
  0x71   : > { %1008 = vmatprep.subr.bf16.mxu0 %v1164_v36 }
  0x74   : > { %1009 = vmatpush3.bf16.msra.mxu0 %v1165_v37 }
  0x75   : > { %1010 = vmatprep.subr.bf16.mxu0 %v1166_v38 }
  0x78   : > { %1011 = vmatpush3.bf16.msra.mxu0 %v1167_v39 }
  0x79   : > { %1012 = vmatprep.subr.bf16.mxu0 %v1168_v40 }
  0x7c   : > { %1013 = vmatpush3.bf16.msra.mxu0 %v1169_v41 }
  0x7d   : > { %1014 = vmatprep.subr.bf16.mxu0 %v1170_v42 }
  0x80   : > { %1015 = vmatpush3.bf16.msra.mxu0 %v1171_v43 }
  0x81   : > { %1016 = vmatprep.subr.bf16.mxu0 %v1172_v44 }
  0x84   : > { %1017 = vmatpush3.bf16.msra.mxu0 %v1173_v45 }
  0x85   : > { %1018 = vmatprep.subr.bf16.mxu0 %v1174_v46 }
  0x88   : > { %1019 = vmatpush3.bf16.msra.mxu0 %v1175_v47 }
  0x89   : > { %1020 = vmatprep.subr.bf16.mxu0 %v1176_v48 }
  0x8c   : > { %1021 = vmatpush3.bf16.msra.mxu0 %v1177_v49 }
 0x12f   : > { %v522_v50 = vpop.f32.mrf.mxu0  ;;  %v565_v2 = vpop.f32.mrf.mxu1 }
 0x130   : > { %v978_v51 = vmul.f32 -1.442695, %v522_v50 }
 0x131   : > { %v524_v52 = vpop.f32.mrf.mxu0  ;;  %v567_v3 = vpop.f32.mrf.mxu1 }
 0x132   : > { %1178 = vpow2.f32 %v978_v51  ;;  %v979_v53 = vmul.f32 -1.442695, %v524_v52 }
 0x133   : > { %v526_v54 = vpop.f32.mrf.mxu0  ;;  %v569_v7 = vpop.f32.mrf.mxu1 }
 0x134   : > { %1180 = vpow2.f32 %v979_v53  ;;  %v980_v55 = vmul.f32 -1.442695, %v526_v54 }
 0x135   : > { %v528_v56 = vpop.f32.mrf.mxu0  ;;  %v571_v14 = vpop.f32.mrf.mxu1 }
 0x136   : > { %1182 = vpow2.f32 %v980_v55  ;;  %v981_v57 = vmul.f32 -1.442695, %v528_v56 }
 0x138   : > { %1184 = vpow2.f32 %v981_v57 }
 0x13f   : > { %v1179_v58 = vpop.eup %1178 }
 0x140   : > { %v586_v60 = vadd.f32 1.0, %v1179_v58 }
 0x141   : > { %v1181_v59 = vpop.eup %1180 }
 0x142   : > { %v587_v61 = vadd.f32 1.0, %v1181_v59 }
 0x143   : > { %v1183_v62 = vpop.eup %1182 }
 0x144   : > { %1186 = vrcp.f32 %v587_v61  ;;  %v588_v63 = vadd.f32 1.0, %v1183_v62 }
 0x145   : > { %v1185_v0 = vpop.eup %1184  ;;  %1188 = vrcp.f32 %v586_v60 }
 0x146   : > { %1190 = vrcp.f32 %v588_v63  ;;  %v589_v1 = vadd.f32 1.0, %v1185_v0 }
 0x148   : > { %1192 = vrcp.f32 %v589_v1 }
 0x151   : > { %v1187_v4 = vpop.eup %1186 }
 0x152   : > { %v1189_v5 = vpop.eup %1188  ;;  %v599_v8 = vmul.f32 %v1187_v4, %v524_v52 }
 0x153   : > { %v1191_v6 = vpop.eup %1190  ;;  %v598_v11 = vmul.f32 %v1189_v5, %v522_v50 }
 0x154   : > { %v600_v9 = vmul.f32 %v1191_v6, %v526_v54  ;;  %v603_v15 = vmul.f32 %v599_v8, %v567_v3 }
 0x155   : > { %v1193_v10 = vpop.eup %1192  ;;  %v602_v17 = vmul.f32 %v598_v11, %v565_v2 }
 0x156   : > { %v601_v12 = vmul.f32 %v1193_v10, %v528_v56  ;;  %v604_v13 = vmul.f32 %v600_v9, %v569_v7 }
 0x158   : > { %v605_v16 = vmul.f32 %v601_v12, %v571_v14  ;;  %v608_v19 = vpack.c.bf16 %v604_v13, %v602_v17 }
 0x15a   : > { %v609_v18 = vpack.c.bf16 %v605_v16, %v603_v15 }
 0x15c   : > { %770 = vmatprep.mubr.bf16.mxu0 %v609_v18 }
 0x15d   : > { %771 = vmatmul.mubr.bf16.vlgmr.msra.gmra.mxu0 %v608_v19 }
 0x21d   : > { %v1022_v20 = vpop.f32.mrf.mxu0 }
 0x21f   : > { %v1023_v21 = vpop.f32.mrf.mxu0 }
 0x220   : > { %v1024_v22 = vadd.f32 %v1023_v21, %v1022_v20 }
 0x221   : > { %v1025_v23 = vpop.f32.mrf.mxu0 }
 0x222   : > { %788 = vst [vmem:[%s275_s4] sm:$0xff] %v1024_v22 }
 0x223   : > { %v1026_v24 = vpop.f32.mrf.mxu0 }
 0x224   : > { %v1027_v25 = vadd.f32 %v1026_v24, %v1025_v23 }
 0x226   : > { %789 = vst [vmem:[%s275_s4 + $0x8] sm:$0xff] %v1027_v25 }
 0x227   : > { %1289 = shalt.err (!%p1286_p1)
}
 0x228   : > { %s1290_s27 = scalar_lea.hbm %s1583_s7, 256  ;;  %s1294_s20 = scalar_lea.hbm %s1634_s3, 512 }
 0x229   : > { %p1291_p6 = scmp.ne.s32.totalorder %s1583_s7, %s1290_s27  ;;  %p1295_p13 = scmp.lt.s32.totalorder %s1583_s7, %s1634_s3 }
 0x22a   : > { %p1296_p12 = scmp.lt.s32.totalorder %s1294_s20, %s1290_s27 }
 0x22b   : > { %p1292_p9 = pnand %p1291_p6, %p1642_p5 }
 0x22c   : > { %p1297_p11 = por %p1296_p12, %p1295_p13 }
 0x22d   : > { %p1293_p3 = pneg %p1292_p9 }
 0x22f   : > { %p1298_p7 = pnand %p1297_p11, %p1293_p3 }
 0x231   : > { %1301 = shalt.err (!%p1298_p7)
}
 0x232   : > { %s1371_s4 = smov 128   ;;  %s1372_s21 = smov 8  }
 0x233   : > { %1036 = dma.vmem_to_hbm [thread:$0]  (%p1642_p5), %s1578_s19, 256, %s1583_s7, %s791_s8, %s1371_s4, %s1371_s4, %s1372_s21  }
 0x234 PF: > { %s821_s26 = sand.u32 1, %s1340_s12   ;;  %p1643_p10 = scmp.ne.s32.totalorder %s1639_s25, 0 }
 0x235   : > { %p1644_p2 = scmp.ge.s32.totalorder %s1360_s17, 2  ;;  %s822_s30 = scalar_lea.sflag [#allocation5], %s821_s26 }
 0x237   : > { %p1050_p4 = pnand %p1644_p2, %p1643_p10 }
 0x239   : > { %p1051_p0 = pneg %p1050_p4 }
 0x23b   : > { %1335 = dma.done.wait (%p1051_p0), %s822_s30, 256  }
 0x23c   : > { %1337 = vsyncadd (%p1051_p0), %s822_s30, 4294967040  ;;  %s20_s17 = sadd.s32 1, %s1360_s17   ;;  %s1645_s12 = smov %s1344_s13 }
 0x23d   : > { %p17_p8 = scmp.ge.s32.totalorder %s20_s17, 4   ;;  %s1646_s13 = smov %s1348_s14 }
 0x23e   : > { %s1647_s14 = smov %s1441_s24  ;;  %s1648_s15 = smov %s1356_s16 }
 0x23f   : > { %s1649_s16 = smov %s1651_s18  ;;  %19 = sbr.rel (!%p17_p8) target bundleno = 7 (0x7), region = 102 }
 0x244   :  { %827 = vsyncpa [#allocation4], 1 }
 0x245   :  { %829 = vsyncpa [#allocation4 + $0x1], 1 }
 0x246   :  { %830 = vsyncpa [#allocation7], 1 }
 0x247   :  { %832 = vsyncpa [#allocation7 + $0x1], 1 }
 0x248   :  { %833 = vsyncpa [#allocation5], 1 }
 0x249   :  { %835 = vsyncpa [#allocation5 + $0x1], 1 }

</bundles_post_ra>
